<compile_context>
chip_gen: v7x
topology: tpu7x:2x2x1
jax: 0.10.0
libtpu: 0.0.40
codegen_flags: <defaults>
</compile_context>

<pallas_src>
import jax
import jax.numpy as jnp
from jax.experimental import pallas as pl
from jax.experimental.pallas import tpu as pltpu


def _sigma_kernel(x_ref, o_ref):
    x = x_ref[...]
    # Literal torch.log(1 + torch.exp(x)); exp/log sit on the EUP slot which has
    # >= 2x headroom vs HBM on v5e/v6e/v7x, so the kernel stays bandwidth-bound.
    o_ref[...] = jnp.log(1.0 + jnp.exp(x))


def _sublane_multiple(dtype) -> int:
    # (8, 128) granule for 32-bit dtypes; sub-32-bit dtypes pack along sublanes
    # (bf16 -> 16 rows, int8/fp8 -> 32 rows).
    return max(8, 32 // jnp.dtype(dtype).itemsize)


def _pick_cols(n: int) -> int:
    cols = 128
    while cols * 2 <= 4096 and n % (cols * 2) == 0:
        cols *= 2
    return cols


def _ceil_to(v: int, m: int) -> int:
    return -(-v // m) * m


def _pick_block_rows(rows: int, sub: int, target_rows: int):
    """Return (block_rows, grid_steps).

    Prefers block_rows that (a) is a multiple of the sublane granule, (b)
    divides `rows` exactly (no partial / masked last block), and (c) yields an
    even number of grid steps >= 2 so both v7x TensorCores are fed.
    """
    target_rows = max(sub, target_rows)

    # Divisors of `rows` that are multiples of the sublane granule.
    divs = set()
    i = 1
    while i * i <= rows:
        if rows % i == 0:
            for d in (i, rows // i):
                if d % sub == 0 and d <= target_rows:
                    divs.add(d)
        i += 1

    best_any = best_multi = best_even = None
    for d in sorted(divs):
        g = rows // d
        best_any = d
        if g >= 2:
            best_multi = d
            if g % 2 == 0:
                best_even = d

    if rows >= 2 * sub:
        best = best_even if best_even is not None else (
            best_multi if best_multi is not None else best_any)
    else:
        best = best_any
    if best is not None:
        return best, rows // best

    # Fallback (rows not divisible by the sublane granule): round to the granule
    # and let Pallas mask the partial last block.
    block_rows = max(sub, (target_rows // sub) * sub)
    if block_rows >= rows:
        if rows >= 2 * sub:
            # Split into ~2 steps so both v7x TensorCores get work.
            block_rows = _ceil_to(-(-rows // 2), sub)
        else:
            block_rows = rows  # full dim -> always a legal block
    return block_rows, pl.cdiv(rows, block_rows)


def sigma_activation(x, *, max_block_bytes=4 * 1024 * 1024,
                     min_pallas_elems=1 << 19):
    """Elementwise log(1 + exp(x)) for any-shape array (NCHW in the module)."""
    orig_shape = x.shape
    n = x.size

    # Small or non-128-divisible sizes: launch + pipeline prologue dominate and
    # padded copies around a bandwidth-bound kernel only add traffic; the plain
    # XLA elementwise op (which fuses into its neighbours) is faster there.
    # TODO(synk): the biggest end-to-end win would be fusing this activation
    # into the producing conv/matmul epilogue rather than streaming standalone.
    if n == 0 or n % 128 != 0 or n < min_pallas_elems:
        return jnp.log(1.0 + jnp.exp(x))

    cols = _pick_cols(n)
    rows = n // cols
    x2d = jnp.reshape(x, (rows, cols))

    itemsize = jnp.dtype(x.dtype).itemsize
    sub = _sublane_multiple(x.dtype)
    target_rows = max(sub, max_block_bytes // (cols * itemsize))
    block_rows, grid_steps = _pick_block_rows(rows, sub, target_rows)

    # VMEM budget: in + out, double-buffered, plus headroom.  Capped well below
    # v7x's 64 MiB/TC physical VMEM (v5e/v6e have 128 MiB).
    block_bytes = block_rows * cols * itemsize
    vmem_limit = int(min(48 * 1024 * 1024,
                         max(16 * 1024 * 1024, 4 * block_bytes + 4 * 1024 * 1024)))

    out2d = pl.pallas_call(
        _sigma_kernel,
        out_shape=jax.ShapeDtypeStruct((rows, cols), x.dtype),
        grid_spec=pltpu.PrefetchScalarGridSpec(
            num_scalar_prefetch=0,
            grid=(grid_steps,),
            in_specs=[pl.BlockSpec((block_rows, cols), lambda i: (i, 0))],
            out_specs=pl.BlockSpec((block_rows, cols), lambda i: (i, 0)),
        ),
        compiler_params=pltpu.CompilerParams(
            dimension_semantics=("parallel",),
            vmem_limit_bytes=vmem_limit,
        ),
    )(x2d)

    return jnp.reshape(out2d, orig_shape)


if __name__ == "__main__":
    key = jax.random.PRNGKey(0)

    # Primary: NCHW input matching the module usage (batch=2, channels=4, 16x16).
    # Force the Pallas path (min_pallas_elems=0) so the kernel itself is run at
    # the module's shape; also run the default path (XLA fallback for tiny n).
    x = jax.random.normal(key, (2, 4, 16, 16), dtype=jnp.float32)
    ref = jnp.log(1.0 + jnp.exp(x))
    out = jax.block_until_ready(sigma_activation(x, min_pallas_elems=0))
    assert out.shape == x.shape and out.dtype == x.dtype
    assert jnp.max(jnp.abs(out - ref)) < 1e-5
    out_default = jax.block_until_ready(sigma_activation(x))
    assert jnp.max(jnp.abs(out_default - ref)) < 1e-5

    # Multi-step, even grid with full (divisor) blocks: rows=32, block_rows=8,
    # grid=(4,) -> both v7x TensorCores fed, no masked stores.
    x2 = jax.random.normal(jax.random.PRNGKey(1), (4, 16, 32, 64), dtype=jnp.float32)
    out2 = jax.block_until_ready(
        sigma_activation(x2, max_block_bytes=8 * 4096 * 4, min_pallas_elems=0))
    ref2 = jnp.log(1.0 + jnp.exp(x2))
    assert out2.shape == x2.shape and out2.dtype == x2.dtype
    assert jnp.max(jnp.abs(out2 - ref2)) < 1e-5

    # Fallback path with a partial last block: rows=15, block_rows=8, grid=(2,)
    # exercises the masked sublane-edge store path.
    x3 = jax.random.normal(jax.random.PRNGKey(2), (3, 5, 16, 16), dtype=jnp.float32)
    out3 = jax.block_until_ready(
        sigma_activation(x3, max_block_bytes=8 * 256 * 4, min_pallas_elems=0))
    ref3 = jnp.log(1.0 + jnp.exp(x3))
    assert out3.shape == x3.shape and out3.dtype == x3.dtype
    assert jnp.max(jnp.abs(out3 - ref3)) < 1e-5

    # bf16: checks the dtype-dependent sublane rounding path.
    x4 = jax.random.normal(jax.random.PRNGKey(3), (2, 4, 16, 16)).astype(jnp.bfloat16)
    out4 = jax.block_until_ready(sigma_activation(x4, min_pallas_elems=0))
    ref4 = jnp.log(1.0 + jnp.exp(x4))
    assert out4.shape == x4.shape and out4.dtype == x4.dtype
    assert jnp.max(jnp.abs(out4.astype(jnp.float32) - ref4.astype(jnp.float32))) < 2e-2

    print("KERNEL_OK")
</pallas_src>

<mosaic_0001>
module attributes {stable_mosaic.version = 11 : i64} {
  func.func @_sigma_kernel(%arg0: i32, %arg1: memref<1x2048xf32, #tpu.memory_space<vmem>>, %arg2: memref<1x2048xf32, #tpu.memory_space<vmem>>) attributes {dimension_semantics = [#tpu.dimension_semantics<parallel>], iteration_bounds = array<i64: 1>, scalar_prefetch = 0 : i64, scratch_operands = 0 : i64, tpu.core_type = #tpu.core_type<tc>, window_params = [{transform_indices = @transform_0, window_bounds = array<i64: 1, 2048>}, {transform_indices = @transform_1, window_bounds = array<i64: 1, 2048>}]} {
    %c0 = arith.constant 0 : index
    %c0_0 = arith.constant 0 : index
    %0 = vector.load %arg1[%c0, %c0_0] : memref<1x2048xf32, #tpu.memory_space<vmem>>, vector<1x2048xf32>
    %1 = math.exp %0 : vector<1x2048xf32>
    %cst = arith.constant 1.000000e+00 : f32
    %2 = vector.broadcast %cst : f32 to vector<1x2048xf32>
    %3 = arith.addf %2, %1 : vector<1x2048xf32>
    %4 = math.log %3 : vector<1x2048xf32>
    %c0_1 = arith.constant 0 : index
    %c0_2 = arith.constant 0 : index
    %5 = vector.load %arg2[%c0_1, %c0_2] : memref<1x2048xf32, #tpu.memory_space<vmem>>, vector<1x2048xf32>
    tpu.vector_store %arg2[%c0_1, %c0_2], %4 {strides = array<i32>} : memref<1x2048xf32, #tpu.memory_space<vmem>>, vector<1x2048xf32>,
    return
  }
  func.func @transform_0(%arg0: i32) -> (i32, i32) {
    %c0_i32 = arith.constant 0 : i32
    %c0_i32_0 = arith.constant 0 : i32
    return %arg0, %c0_i32 : i32, i32
  }
  func.func @transform_1(%arg0: i32) -> (i32, i32) {
    %c0_i32 = arith.constant 0 : i32
    %c0_i32_0 = arith.constant 0 : i32
    return %arg0, %c0_i32 : i32, i32
  }
}

</mosaic_0001>

<bundles_post_ra>
// kernel: tpu_custom_call.1
= control target key start
LH: loop header
LB: loop body
LE: loop exit
PB: predicated region body
PF: predicated region fallthrough
CT: control target
= control target key end

     0   :  { %6 = vsyncpa [#allocation3], 0  ;;  %s144_s0 = inlined_call_operand.hbm [shape: f32[1,2048], index: 0, kind: input, shape index: {}]   ;;  %s145_s1 = inlined_call_operand.hbm [shape: f32[1,2048], index: 1, kind: output, shape index: {}]  }
   0x1   :  { %7 = vsyncpa [#allocation4], 0  ;;  %s108_s6 = smov [#allocation2]   ;;  %s60_s10 = scalar_lea.hbm %s144_s0, 256 }
   0x2   :  { %s14_s7 = sshll.u32 %s108_s6, 4  ;;  %p61_p0 = scmp.ne.s32.totalorder %s144_s0, %s60_s10  ;;  %s15_s7 = int_to_ptr.vmem [resolvable:$true] %s14_s7 }
   0x3   :  { %p64_p1 = scmp.lt.u32.totalorder %s60_s10, %s144_s0 }
   0x5   :  { %p66_p2 = pnand %p64_p1, %p61_p0 }
   0x7   :  { %69 = shalt.err (!%p66_p2)
}
   0x8   :  { %s70_s15 = scalar_lea.vmem %s15_s7, 256  ;;  %p75_p4 = scmp.lt.s32.totalorder %s15_s7, %s15_s7 }
   0x9   :  { %p71_p3 = scmp.ne.s32.totalorder %s15_s7, %s70_s15  ;;  %p76_p5 = scmp.lt.s32.totalorder %s70_s15, %s70_s15 }
   0xb   :  { %p77_p6 = por %p76_p5, %p75_p4 }
   0xd   :  { %p78_p7 = pnand %p77_p6, %p71_p3 }
   0xf   :  { %81 = shalt.err (!%p78_p7)
}
  0x10   :  { %17 = dma.hbm_to_vmem [thread:$0]  %s144_s0, 256, %s15_s7, [#allocation3]  }
  0x11   :  { %104 = dma.done.wait [#allocation3], 256  }
  0x12   :  { %105 = vsyncadd [#allocation3], 4294967040  ;;  %v21_v0 = vld [vmem:[#allocation2] sm:$0xff]  ;;  %v22_v1 = vld [vmem:[#allocation2 + $0x8] sm:$0xff]  ;;  %s109_s18 = smov [#allocation5]  }
  0x13   :  { %v23_v2 = vmul.f32 1.442695, %v21_v0  ;;  %v25_v3 = vmul.f32 1.442695, %v22_v1  ;;  %s41_s19 = sshll.u32 %s109_s18, 4  ;;  %s42_s19 = int_to_ptr.vmem [resolvable:$true] %s41_s19 }
  0x14   :  { %s82_s0 = scalar_lea.vmem %s42_s19, 256  ;;  %p87_p9 = scmp.lt.s32.totalorder %s42_s19, %s42_s19 }
  0x15   :  { %52 = vpow2.f32 %v23_v2  ;;  %p83_p8 = scmp.ne.s32.totalorder %s42_s19, %s82_s0  ;;  %p88_p10 = scmp.lt.s32.totalorder %s82_s0, %s82_s0 }
  0x16   :  { %54 = vpow2.f32 %v25_v3 }
  0x17   :  { %p89_p11 = por %p88_p10, %p87_p9 }
  0x19   :  { %p90_p12 = pnand %p89_p11, %p83_p8 }
  0x1f   :  { %v53_v4 = vpop.eup %52 }
  0x20   :  { %v55_v5 = vpop.eup %54  ;;  %v27_v6 = vadd.f32 1.0, %v53_v4 }
  0x21   :  { %v28_v7 = vadd.f32 1.0, %v55_v5 }
  0x22   :  { %56 = vlog2.f32 %v27_v6 }
  0x23   :  { %58 = vlog2.f32 %v28_v7 }
  0x2c   :  { %v57_v8 = vpop.eup %56 }
  0x2d   :  { %v59_v9 = vpop.eup %58  ;;  %v30_v10 = vmul.f32 0.6931472, %v57_v8 }
  0x2e   :  { %v32_v11 = vmul.f32 0.6931472, %v59_v9 }
  0x2f   :  { %33 = vst [vmem:[#allocation5] sm:$0xff] %v30_v10 }
  0x30   :  { %34 = vst [vmem:[#allocation5 + $0x8] sm:$0xff] %v32_v11 }
  0x31   :  { %93 = shalt.err (!%p90_p12)
}
  0x32   :  { %s94_s22 = scalar_lea.hbm %s145_s1, 256 }
  0x33   :  { %p95_p13 = scmp.ne.s32.totalorder %s145_s1, %s94_s22  ;;  %p98_p0 = scmp.lt.u32.totalorder %s94_s22, %s145_s1 }
  0x35   :  { %p100_p1 = pnand %p98_p0, %p95_p13 }
  0x37   :  { %103 = shalt.err (!%p100_p1)
}
  0x38   :  { %44 = dma.vmem_to_hbm [thread:$0]  %s42_s19, 256, %s145_s1, [#allocation4]  }
  0x39   :  { %106 = dma.done.wait [#allocation4], 256  }
  0x3a   :  { %107 = vsyncadd [#allocation4], 4294967040 }
  0x3b   :  { %48 = vsyncpa [#allocation3], 1 }
  0x3c   :  { %49 = vsyncpa [#allocation4], 1 }

</bundles_post_ra>
